<compile_context>
chip_gen: v6e
topology: v6e:2x2x1
jax: 0.10.0
libtpu: 0.0.40
codegen_flags: <defaults>
</compile_context>

<pallas_src>
import math

import jax
import jax.numpy as jnp
from jax.experimental import pallas as pl
from jax.experimental.pallas import tpu as pltpu


def _pe_add_kernel(x_ref, pe_ref, o_ref):
    # x_ref:  (tS, B, D) tile of the input
    # pe_ref: (tS, D)    matching rows of the positional-encoding table
    # o_ref:  (tS, B, D)
    pe = pe_ref[...].astype(x_ref.dtype)[:, None, :]   # broadcast over batch
    o_ref[...] = (x_ref[...] + pe).astype(o_ref.dtype)


def make_pe_table(d_model: int, max_len: int = 5000,
                  dtype=jnp.float32) -> jnp.ndarray:
    """Deterministic sinusoidal positional-encoding table, (max_len, d_model).

    Built in `dtype` so no cast is needed on the kernel's store path.
    Handles odd d_model (the even/odd column counts differ) unlike the
    original PyTorch snippet.
    """
    position = jnp.arange(0, max_len, dtype=jnp.float32)[:, None]       # (L, 1)
    div_term = jnp.exp(
        jnp.arange(0, d_model, 2, dtype=jnp.float32)
        * (-math.log(10000.0) / d_model)
    )                                                                    # (ceil(D/2),)
    sin_part = jnp.sin(position * div_term)                              # (L, ceil(D/2))
    cos_part = jnp.cos(position * div_term)                              # (L, ceil(D/2))
    pe = jnp.zeros((max_len, d_model), dtype=jnp.float32)
    pe = pe.at[:, 0::2].set(sin_part)
    pe = pe.at[:, 1::2].set(cos_part[:, : d_model // 2])
    return pe.astype(dtype)


def _pick_seq_tile(S: int, B: int, D: int, itemsize: int,
                   target_bytes: int = 2 << 20) -> int:
    """Sequence-tile length: ~2 MiB of x per block, multiple of 8, >= 8."""
    rows = max(8, target_bytes // max(1, B * D * itemsize))
    rows = (rows // 8) * 8
    rows = min(rows, ((S + 7) // 8) * 8)   # never (much) more than the array
    return int(rows)


def positional_encoding_forward(x: jnp.ndarray, pe_table: jnp.ndarray,
                                *, seq_tile: int | None = None,
                                donate_x: bool = False) -> jnp.ndarray:
    """x: (seq_len, batch, d_model). Returns x + pe[:seq_len] (eval-mode dropout).

    `donate_x=True` adds input_output_aliases={0: 0} so the output reuses x's
    buffer — only enable when x is donated (e.g. under jit with donate_argnums),
    otherwise the caller's copy of x may be clobbered.
    """
    S, B, D = x.shape
    max_len, d_pe = pe_table.shape
    assert d_pe == D, "pe_table d_model mismatch"
    assert max_len >= S, "sequence longer than max_len"

    tS = seq_tile if seq_tile is not None else _pick_seq_tile(
        S, B, D, jnp.dtype(x.dtype).itemsize)
    grid = (pl.cdiv(S, tS),)

    extra_kwargs = {}
    if donate_x:
        extra_kwargs["input_output_aliases"] = {0: 0}

    out = pl.pallas_call(
        _pe_add_kernel,
        out_shape=jax.ShapeDtypeStruct((S, B, D), x.dtype),
        grid_spec=pltpu.PrefetchScalarGridSpec(
            num_scalar_prefetch=0,
            grid=grid,
            in_specs=[
                # x: tile along seq; full batch/d_model per block (lane dim = D).
                pl.BlockSpec((tS, B, D), lambda i: (i, 0, 0)),
                # pe: the SAME seq rows, fetched straight from the full table.
                pl.BlockSpec((tS, D), lambda i: (i, 0)),
            ],
            out_specs=pl.BlockSpec((tS, B, D), lambda i: (i, 0, 0)),
        ),
        compiler_params=pltpu.CompilerParams(
            # Independent seq tiles -> shard across v7x's two TensorCores;
            # neutral on single-TC v5e/v6e.
            dimension_semantics=("parallel",),
        ),
        **extra_kwargs,
    )(x, pe_table)
    return out


if __name__ == "__main__":
    d_model = 32
    seq_len = 64
    batch = 2
    max_len = 128  # small deterministic buffer, consistent with the module

    key = jax.random.PRNGKey(0)
    x = jax.random.normal(key, (seq_len, batch, d_model), dtype=jnp.float32)

    # pe built in x.dtype (no cast on the kernel store path).
    pe_table = make_pe_table(d_model, max_len=max_len, dtype=x.dtype)

    # Reference (eval-mode dropout == identity), computed before the call.
    y_ref = x + pe_table[:seq_len, :][:, None, :]

    # seq_tile=16 -> 4 grid steps, exercising the pipelined multi-tile path
    # even at this small demo size.
    y = positional_encoding_forward(x, pe_table, seq_tile=16)
    y = jax.block_until_ready(y)

    assert y.shape == (seq_len, batch, d_model)
    assert jnp.allclose(y, y_ref, atol=1e-6), "mismatch vs reference"

    print("KERNEL_OK")
</pallas_src>

<mosaic_0001>
module attributes {stable_mosaic.version = 11 : i64} {
  func.func @_pe_add_kernel(%arg0: i32, %arg1: memref<16x2x32xf32, #tpu.memory_space<vmem>>, %arg2: memref<16x32xf32, #tpu.memory_space<vmem>>, %arg3: memref<16x2x32xf32, #tpu.memory_space<vmem>>) attributes {dimension_semantics = [#tpu.dimension_semantics<parallel>], iteration_bounds = array<i64: 4>, scalar_prefetch = 0 : i64, scratch_operands = 0 : i64, tpu.core_type = #tpu.core_type<tc>, window_params = [{transform_indices = @transform_0, window_bounds = array<i64: 16, 2, 32>}, {transform_indices = @transform_1, window_bounds = array<i64: 16, 32>}, {transform_indices = @transform_2, window_bounds = array<i64: 16, 2, 32>}]} {
    %c0 = arith.constant 0 : index
    %c0_0 = arith.constant 0 : index
    %0 = vector.load %arg2[%c0, %c0_0] : memref<16x32xf32, #tpu.memory_space<vmem>>, vector<16x32xf32>
    %1 = vector.shape_cast %0 : vector<16x32xf32> to vector<16x1x32xf32>
    %c0_1 = arith.constant 0 : index
    %c0_2 = arith.constant 0 : index
    %c0_3 = arith.constant 0 : index
    %2 = vector.load %arg1[%c0_1, %c0_2, %c0_3] : memref<16x2x32xf32, #tpu.memory_space<vmem>>, vector<16x2x32xf32>
    %3 = vector.broadcast %1 : vector<16x1x32xf32> to vector<16x2x32xf32>
    %4 = arith.addf %2, %3 : vector<16x2x32xf32>
    %c0_4 = arith.constant 0 : index
    %c0_5 = arith.constant 0 : index
    %c0_6 = arith.constant 0 : index
    %5 = vector.load %arg3[%c0_4, %c0_5, %c0_6] : memref<16x2x32xf32, #tpu.memory_space<vmem>>, vector<16x2x32xf32>
    tpu.vector_store %arg3[%c0_4, %c0_5, %c0_6], %4 {strides = array<i32>} : memref<16x2x32xf32, #tpu.memory_space<vmem>>, vector<16x2x32xf32>,
    return
  }
  func.func @transform_0(%arg0: i32) -> (i32, i32, i32) {
    %c0_i32 = arith.constant 0 : i32
    %c0_i32_0 = arith.constant 0 : i32
    %c0_i32_1 = arith.constant 0 : i32
    return %arg0, %c0_i32, %c0_i32_0 : i32, i32, i32
  }
  func.func @transform_1(%arg0: i32) -> (i32, i32) {
    %c0_i32 = arith.constant 0 : i32
    %c0_i32_0 = arith.constant 0 : i32
    return %arg0, %c0_i32 : i32, i32
  }
  func.func @transform_2(%arg0: i32) -> (i32, i32, i32) {
    %c0_i32 = arith.constant 0 : i32
    %c0_i32_0 = arith.constant 0 : i32
    %c0_i32_1 = arith.constant 0 : i32
    return %arg0, %c0_i32, %c0_i32_0 : i32, i32, i32
  }
}

</mosaic_0001>

<bundles_post_ra>
// kernel: tpu_custom_call.1
= control target key start
LH: loop header
LB: loop body
LE: loop exit
PB: predicated region body
PF: predicated region fallthrough
CT: control target
= control target key end

     0   :  { %s514_s9 = smov 0   ;;  %s618_s0 = inlined_call_operand.vmem [shape: f32[64,2,32], index: 0, kind: input, shape index: {}]   ;;  %s619_s1 = inlined_call_operand.vmem [shape: f32[128,32], index: 1, kind: input, shape index: {}]   ;;  %s620_s2 = inlined_call_operand.vmem [shape: f32[64,2,32], index: 2, kind: output, shape index: {}]  }
   0x1 LB: > { %s468_s10 = sadd.s32 4294967295, %s496_s9   ;;  %p472_p0 = scmp.ge.s32.totalorder %s496_s9, 1  ;;  %s496_s9 = sphi %s514_s9, %s12_s9  }
   0x2   : > { %p124_p1 = scmp.lt.s32.totalorder %s496_s9, 5 }
   0x4   : > { %p125_p2 = pnand %p472_p0, %p124_p1 }
   0x5   : > { %s473_s11 = sshll.u32 (!%p125_p2), %s468_s10, 4  ;;  %s475_s12 = sshll.u32 (!%p125_p2), %s468_s10, 1 }
   0x6   : > { %128 = sbr.rel (%p125_p2) target bundleno = 39 (0x27), region = 28  ;;  %p152_p3 = scmp.lt.s32.totalorder (!%p125_p2), %s473_s11, 63 }
   0x7   : > { %p158_p4 = scmp.lt.s32.totalorder (!%p125_p2), %s475_s12, 15 }
   0xb   : > { %v177_v0 = vlaneseq  ;;  %v498_v1 = vmov 1966171168   ;;  %s622_s11 = smov (!%p152_p3, %s473_s11), 63  ;;  %s624_s12 = smov (!%p158_p4, %s475_s12), 15  ;;  %vm383_vm0 = vcmask 254976  }
   0xc   : > { %v175_v2 = vunpack.c.l.s4 %v498_v1  ;;  %s474_s13 = sshll.u32 %s622_s11, 1  ;;  %s476_s14 = sshll.u32 %s624_s12, 3 }
   0xd   : > { %v178_v3 = vshrl.u32 %v177_v0, 7  ;;  %s161_s17 = scalar_lea.vmem %s619_s1, %s476_s14  ;;  %s530_s20 = scalar_lea.vmem %s618_s0, %s474_s13 }
   0xe   : > { %v176_v4 = vunpack.c.0.s8 %v175_v2  ;;  %v169_v6 = vld [vmem:[%s161_s17] sm:$0xff]  ;;  %v170_v10 = vld [vmem:[%s161_s17 + $0x8] sm:$0xff]  ;;  %s545_s23 = scalar_lea.vmem %s620_s2, %s474_s13  ;;  %v279_v36 = vld [vmem:[%s530_s20 + $0x10] sm:$0x3] }
   0xf   : > { %v533_v8 = vsub.s32 0, %v178_v3  ;;  %v173_v9 = vcombine.high %v169_v6, %v169_v6  ;;  %v271_v15 = vld [vmem:[%s530_s20] sm:$0x3]  ;;  %v222_v16 = vcombine.high %v170_v10, %v170_v10  ;;  %v272_v21 = vld [vmem:[%s530_s20 + $0x2] sm:$0x3] }
  0x10   : > { %v522_v5 = vsub.s32 %v176_v4, %v178_v3  ;;  %v273_v22 = vld [vmem:[%s530_s20 + $0x4] sm:$0x3]  ;;  %v275_v31 = vld [vmem:[%s530_s20 + $0x8] sm:$0x3]  ;;  %v274_v32 = vld [vmem:[%s530_s20 + $0x6] sm:$0x3] }
  0x11   : > { %v276_v41 = vld [vmem:[%s530_s20 + $0xa] sm:$0x3]  ;;  %v277_v42 = vld [vmem:[%s530_s20 + $0xc] sm:$0x3]  ;;  %v280_v48 = vld [vmem:[%s530_s20 + $0x12] sm:$0x3] }
  0x12   : > { %v180_v7 = vrot.slane %v169_v6, %v522_v5  ;;  %v187_v13 = vrot.slane %v173_v9, %v522_v5  ;;  %v229_v14 = vrot.slane %v170_v10, %v522_v5  ;;  %v236_v26 = vrot.slane %v222_v16, %v522_v5  ;;  %v278_v50 = vld [vmem:[%s530_s20 + $0xe] sm:$0x3]  ;;  %v281_v57 = vld [vmem:[%s530_s20 + $0x14] sm:$0x3]  ;;  %v282_v61 = vld [vmem:[%s530_s20 + $0x16] sm:$0x3] }
  0x13   : > { %v283_v2 = vld [vmem:[%s530_s20 + $0x18] sm:$0x3]  ;;  %v284_v10 = vld [vmem:[%s530_s20 + $0x1a] sm:$0x3] }
  0x14   : > { %v196_v11 = vrot.slane %v180_v7, %v522_v5  ;;  %v188_v12 = vcombine.high %v180_v7, %v180_v7  ;;  %v203_v20 = vrot.slane %v187_v13, %v522_v5  ;;  %v189_v23 = vcombine.high %v187_v13, %v187_v13 }
  0x15   : > { %v245_v24 = vrot.slane %v229_v14, %v522_v5  ;;  %v237_v25 = vcombine.high %v229_v14, %v229_v14  ;;  %v252_v62 = vrot.slane %v236_v26, %v522_v5  ;;  %v238_v63 = vcombine.high %v236_v26, %v236_v26 }
  0x16   : > { %v290_v17 = vrot.slane %v196_v11, %v533_v8  ;;  %v210_v18 = vrot.slane %v188_v12, %v522_v5  ;;  %v218_v19 = vcombine.high %v196_v11, %v196_v11  ;;  %v306_v33 = vrot.slane %v203_v20, %v533_v8  ;;  %v285_v11 = vld [vmem:[%s530_s20 + $0x1c] sm:$0x3] }
  0x17   : > { %v217_v34 = vrot.slane %v189_v23, %v522_v5  ;;  %v219_v35 = vcombine.high %v203_v20, %v203_v20  ;;  %v322_v37 = vrot.slane %v245_v24, %v533_v8  ;;  %v259_v43 = vrot.slane %v237_v25, %v522_v5 }
  0x18   : > { %v367_v27 = vadd.f32 %v290_v17, %v271_v15  ;;  %v294_v28 = vrot.slane %v210_v18, %v533_v8  ;;  %v298_v29 = vrot.slane %v218_v19, %v533_v8  ;;  %v220_v30 = vcombine.high %v210_v18, %v210_v18 }
  0x19   : > { %v371_v44 = vadd.f32 %v306_v33, %v275_v31  ;;  %v310_v45 = vrot.slane %v217_v34, %v533_v8  ;;  %v314_v46 = vrot.slane %v219_v35, %v533_v8  ;;  %v221_v47 = vcombine.high %v217_v34, %v217_v34 }
  0x1a   : > { %384 = vst.msk [vmem:[%s545_s23] sm:$0x3] %vm383_vm0, %v367_v27  ;;  %v368_v38 = vadd.f32 %v294_v28, %v272_v21  ;;  %v369_v39 = vadd.f32 %v298_v29, %v273_v22  ;;  %v302_v40 = vrot.slane %v220_v30, %v533_v8  ;;  %v375_v51 = vadd.f32 %v322_v37, %v279_v36 }
  0x1b   : > { %v326_v52 = vrot.slane %v259_v43, %v533_v8  ;;  %v267_v53 = vcombine.high %v245_v24, %v245_v24  ;;  %388 = vst.msk [vmem:[%s545_s23 + $0x8] sm:$0x3] %vm383_vm0, %v371_v44  ;;  %v372_v54 = vadd.f32 %v310_v45, %v276_v41  ;;  %v373_v55 = vadd.f32 %v314_v46, %v277_v42 }
  0x1c   : > { %385 = vst.msk [vmem:[%s545_s23 + $0x2] sm:$0x3] %vm383_vm0, %v368_v38  ;;  %386 = vst.msk [vmem:[%s545_s23 + $0x4] sm:$0x3] %vm383_vm0, %v369_v39  ;;  %v370_v49 = vadd.f32 %v302_v40, %v274_v32  ;;  %v318_v56 = vrot.slane %v221_v47, %v533_v8  ;;  %v269_v58 = vcombine.high %v259_v43, %v259_v43 }
  0x1d   : > { %392 = vst.msk [vmem:[%s545_s23 + $0x10] sm:$0x3] %vm383_vm0, %v375_v51  ;;  %v376_v59 = vadd.f32 %v326_v52, %v280_v48  ;;  %v330_v60 = vrot.slane %v267_v53, %v533_v8  ;;  %389 = vst.msk [vmem:[%s545_s23 + $0xa] sm:$0x3] %vm383_vm0, %v372_v54  ;;  %v338_v4 = vrot.slane %v252_v62, %v533_v8 }
  0x1e   : > { %387 = vst.msk [vmem:[%s545_s23 + $0x6] sm:$0x3] %vm383_vm0, %v370_v49  ;;  %390 = vst.msk [vmem:[%s545_s23 + $0xc] sm:$0x3] %vm383_vm0, %v373_v55  ;;  %v374_v0 = vadd.f32 %v318_v56, %v278_v50  ;;  %v334_v1 = vrot.slane %v269_v58, %v533_v8  ;;  %v266_v6 = vrot.slane %v238_v63, %v522_v5  ;;  %v286_v5 = vld [vmem:[%s530_s20 + $0x1e] sm:$0x3] }
  0x1f   : > { %393 = vst.msk [vmem:[%s545_s23 + $0x12] sm:$0x3] %vm383_vm0, %v376_v59  ;;  %v377_v3 = vadd.f32 %v330_v60, %v281_v57  ;;  %v268_v7 = vcombine.high %v252_v62, %v252_v62  ;;  %v379_v12 = vadd.f32 %v338_v4, %v283_v2 }
  0x20   : > { %391 = vst.msk [vmem:[%s545_s23 + $0xe] sm:$0x3] %vm383_vm0, %v374_v0  ;;  %v378_v9 = vadd.f32 %v334_v1, %v282_v61  ;;  %v342_v13 = vrot.slane %v266_v6, %v533_v8  ;;  %v270_v15 = vcombine.high %v266_v6, %v266_v6 }
  0x21   : > { %394 = vst.msk [vmem:[%s545_s23 + $0x14] sm:$0x3] %vm383_vm0, %v377_v3  ;;  %v346_v14 = vrot.slane %v268_v7, %v533_v8  ;;  %396 = vst.msk [vmem:[%s545_s23 + $0x18] sm:$0x3] %vm383_vm0, %v379_v12 }
  0x22   : > { %395 = vst.msk [vmem:[%s545_s23 + $0x16] sm:$0x3] %vm383_vm0, %v378_v9  ;;  %v380_v16 = vadd.f32 %v342_v13, %v284_v10  ;;  %v350_v18 = vrot.slane %v270_v15, %v533_v8 }
  0x23   : > { %v381_v17 = vadd.f32 %v346_v14, %v285_v11 }
  0x24   : > { %397 = vst.msk [vmem:[%s545_s23 + $0x1a] sm:$0x3] %vm383_vm0, %v380_v16  ;;  %v382_v19 = vadd.f32 %v350_v18, %v286_v5 }
  0x25   : > { %398 = vst.msk [vmem:[%s545_s23 + $0x1c] sm:$0x3] %vm383_vm0, %v381_v17 }
  0x26   : > { %399 = vst.msk [vmem:[%s545_s23 + $0x1e] sm:$0x3] %vm383_vm0, %v382_v19 }
  0x27 PF: > { %s12_s9 = sadd.s32 1, %s496_s9  }
  0x28   : > { %p9_p5 = scmp.ge.s32.totalorder %s12_s9, 6  }
  0x2a   :  { %11 = sbr.rel (!%p9_p5) target bundleno = 1 (0x1), region = 61 }

</bundles_post_ra>
